<compile_context>
chip_gen: v6e
topology: v6e:2x2x1
jax: 0.10.0
libtpu: 0.0.40
codegen_flags: <defaults>
</compile_context>

<pallas_src>
from functools import partial

import jax
import jax.numpy as jnp
import numpy as np
from jax.experimental import pallas as pl
from jax.experimental.pallas import tpu as pltpu


def _upsample_reflect_index(n_src, up, pad):
    """Padded-upsampled index -> source index (nearest upsample + reflection pad)."""
    n_up = n_src * up
    q = np.arange(n_up + 2 * pad)
    u = q - pad
    u = np.where(u < 0, -u, u)                        # reflect at the start
    u = np.where(u >= n_up, 2 * (n_up - 1) - u, u)    # reflect at the end
    return u // up                                    # nearest-neighbour source index


def _conv_in_relu_kernel(x_ref, wb_ref, a_ref, p_ref, r_ref, b_ref, o_ref,
                         *, nb, kh, h, cw, eps):
    # x_ref : (NB, H0, Cin*W0)        original (not upsampled) input, lane-dense cols
    # wb_ref: (Cin*W0, KH*Cout*W)     weights pre-contracted with the kw/col selection
    # a_ref : (NB*H, KH*NB*H0)        fused row selection (upsample+reflect+tap+stride,
    #                                 block-diagonal over samples, stacked over kh)
    # p_ref : (2, Cout*W)             IN gamma / beta, repeated W per channel
    # r_ref : (Cout*W, Cout)          per-channel reduce (includes 1/(H*W))
    # b_ref : (Cout, Cout*W)          per-channel broadcast back to lanes
    # o_ref : (NB, H, Cout*W)
    nb_h0 = x_ref.shape[0] * x_ref.shape[1]

    x0 = x_ref[...].astype(jnp.float32).reshape(nb_h0, x_ref.shape[2])

    # 1) ONE matmul contracts input channels + all kw taps for all NB samples.
    #    Columns are ordered (kh, cout, x) -> lane-dense, tile-aligned slices.
    q = jnp.dot(x0, wb_ref[...], preferred_element_type=jnp.float32)  # (NB*H0, KH*CW)

    # 2) Stack the kh slices along sublanes (tile-aligned copies) and do ONE
    #    row-expansion matmul instead of KH accumulating ones.
    q_st = jnp.concatenate([q[:, a * cw:(a + 1) * cw] for a in range(kh)],
                           axis=0)                                    # (KH*NB*H0, CW)
    acc = jnp.dot(a_ref[...], q_st,
                  preferred_element_type=jnp.float32)                 # (NB*H, CW)
    acc3 = acc.reshape(nb, h, cw)                                     # (NB, H, CW)

    # (Conv bias intentionally omitted: it is exactly cancelled by the
    #  per-channel mean subtraction of InstanceNorm.)

    # 3) Per-sample, per-channel InstanceNorm statistics.
    #    Row sums on the VPU; the lane-group (per-channel) reduce + broadcast
    #    goes through one small factored matmul chain for both stats at once.
    s1 = jnp.sum(acc3, axis=1)                                        # (NB, CW)
    s2 = jnp.sum(acc3 * acc3, axis=1)                                 # (NB, CW)
    stats = jnp.concatenate([s1, s2], axis=0)                         # (2*NB, CW)
    per_ch = jnp.dot(stats, r_ref[...],
                     preferred_element_type=jnp.float32)              # (2*NB, Cout)
    bcast = jnp.dot(per_ch, b_ref[...],
                    preferred_element_type=jnp.float32)               # (2*NB, CW)
    mean = bcast[:nb][:, None, :]                                     # (NB, 1, CW)
    ex2 = bcast[nb:][:, None, :]                                      # (NB, 1, CW)
    var = jnp.maximum(ex2 - mean * mean, 0.0)
    inv_std = jax.lax.rsqrt(var + eps)

    params = p_ref[...]                                               # (2, CW)
    gamma = params[0][None, None, :]
    beta = params[1][None, None, :]
    y = (acc3 - mean) * (inv_std * gamma) + beta                      # affine IN
    y = jnp.maximum(y, 0.0)                                           # ReLU
    o_ref[...] = y.astype(o_ref.dtype)


def make_upsample_conv_inst_relu(w_oihw, bias, gamma, beta, *, in_shape,
                                 upsample=2, stride=1, eps=1e-5, nb=None,
                                 dtype=jnp.float32):
    """Builds all constants once and returns a jitted fn(x_nchw) -> y_nchw."""
    del bias  # exactly cancelled by InstanceNorm's mean subtraction (exact removal)

    N, Cin, H0, W0 = in_shape
    Cout, Cin_w, KH, KW = w_oihw.shape
    assert Cin == Cin_w
    assert KH == KW, "reflection pad is derived from KH only (square kernels)"
    up = upsample if upsample else 1
    pad = int(np.floor(KH / 2))
    assert pad <= up * H0 - 1 and pad <= up * W0 - 1, "reflection pad too large"

    Hp = up * H0 + 2 * pad
    Wp = up * W0 + 2 * pad
    H = (Hp - KH) // stride + 1
    W = (Wp - KW) // stride + 1
    CW = Cout * W

    # ---- samples per grid step: block as many as practical, but keep the grid
    # ---- length >= 2 when possible so both v7x TensorCores stay busy.
    if nb is None:
        cap = 8
        divs = [d for d in range(1, N + 1) if N % d == 0 and d <= cap]
        pref = [d for d in divs if N // d >= 2] or divs
        nb = max(pref)
    assert N % nb == 0
    grid = (N // nb,)

    # ---- host-side constants: upsample + reflect-pad + taps as 0/1 selections ----
    rmap = _upsample_reflect_index(H0, up, pad)                               # (Hp,)
    cmap = _upsample_reflect_index(W0, up, pad)                               # (Wp,)
    row_sel = (rmap[:, None] == np.arange(H0)[None, :]).astype(np.float32)    # (Hp, H0)
    col_sel = (cmap[:, None] == np.arange(W0)[None, :]).astype(np.float32)    # (Wp, W0)
    a_taps = np.stack([row_sel[a:a + (H - 1) * stride + 1:stride]
                       for a in range(KH)], axis=0)                           # (KH, H, H0)
    b_taps = np.stack([col_sel[b:b + (W - 1) * stride + 1:stride].T
                       for b in range(KW)], axis=0)                           # (KW, W0, W)

    # Fused row operator: block-diagonal over the NB samples, concatenated over kh.
    eye_nb = np.eye(nb, dtype=np.float32)
    a_fused = np.concatenate([np.kron(eye_nb, a_taps[a]) for a in range(KH)],
                             axis=1)                                          # (NB*H, KH*NB*H0)

    # Fold the kw/column selection into the conv weights:
    #   WB[(ci,j), (kh,co,x)] = sum_kw w[co,ci,kh,kw] * b_taps[kw][j,x]
    wb = jnp.einsum("ocab,bjx->cjaox", w_oihw.astype(jnp.float32),
                    jnp.asarray(b_taps)).reshape(Cin * W0, KH * CW)

    # gamma / beta expanded to the (co, x) lane layout and packed together.
    params = jnp.stack([jnp.repeat(gamma, W), jnp.repeat(beta, W)],
                       axis=0).astype(jnp.float32)                            # (2, CW)

    # Factored per-channel mean operator: reduce each W-wide lane group
    # (with the 1/(H*W) normalizer) then broadcast it back over the group.
    rmat = np.kron(np.eye(Cout, dtype=np.float32),
                   np.ones((W, 1), np.float32)) / float(H * W)                # (CW, Cout)
    bmat = np.kron(np.eye(Cout, dtype=np.float32),
                   np.ones((1, W), np.float32))                               # (Cout, CW)

    a_fused_j = jnp.asarray(a_fused)
    rmat_j = jnp.asarray(rmat)
    bmat_j = jnp.asarray(bmat)

    kern = partial(_conv_in_relu_kernel, nb=nb, kh=KH, h=H, cw=CW, eps=eps)
    pc = pl.pallas_call(
        kern,
        out_shape=jax.ShapeDtypeStruct((N, H, CW), dtype),
        grid=grid,
        in_specs=[
            pl.BlockSpec((nb, H0, Cin * W0), lambda n: (n, 0, 0)),
            pl.BlockSpec((Cin * W0, KH * CW), lambda n: (0, 0)),
            pl.BlockSpec((nb * H, KH * nb * H0), lambda n: (0, 0)),
            pl.BlockSpec((2, CW), lambda n: (0, 0)),
            pl.BlockSpec((CW, Cout), lambda n: (0, 0)),
            pl.BlockSpec((Cout, CW), lambda n: (0, 0)),
        ],
        out_specs=pl.BlockSpec((nb, H, CW), lambda n: (n, 0, 0)),
        compiler_params=pltpu.CompilerParams(dimension_semantics=("parallel",)),
    )

    @jax.jit
    def apply(x_nchw):
        # Entry conversion: rows on sublanes, (channel, col) on lanes.
        x_t = jnp.transpose(x_nchw, (0, 2, 1, 3)).reshape(N, H0, Cin * W0)
        out_flat = pc(x_t, wb, a_fused_j, params, rmat_j, bmat_j)
        # Exit conversion: (N, H, Cout*W) -> (N, Cout, H, W).  For chained
        # blocks, keep the flat layout instead and skip both conversions.
        return out_flat.reshape(N, H, Cout, W).transpose(0, 2, 1, 3)

    return apply


def upsample_conv_inst_relu(x_nchw, w_oihw, bias, gamma, beta,
                            *, upsample=2, stride=1, eps=1e-5):
    """Convenience one-shot wrapper (constants NOT hoisted; prefer the factory)."""
    fn = make_upsample_conv_inst_relu(w_oihw, bias, gamma, beta,
                                      in_shape=x_nchw.shape, upsample=upsample,
                                      stride=stride, eps=eps, dtype=x_nchw.dtype)
    return fn(x_nchw)


def _reference(x_nchw, w_oihw, bias, gamma, beta, *, upsample=2, stride=1, eps=1e-5):
    """Pure-JAX reference mirroring the PyTorch forward."""
    x = x_nchw
    if upsample:
        x = jnp.repeat(jnp.repeat(x, upsample, axis=2), upsample, axis=3)
    pad = int(np.floor(w_oihw.shape[2] / 2))
    x = jnp.pad(x, ((0, 0), (0, 0), (pad, pad), (pad, pad)), mode="reflect")
    y = jax.lax.conv_general_dilated(
        x, w_oihw, window_strides=(stride, stride), padding="VALID",
        dimension_numbers=("NCHW", "OIHW", "NCHW"))
    y = y + bias.reshape(1, -1, 1, 1)
    mean = jnp.mean(y, axis=(2, 3), keepdims=True)
    var = jnp.mean((y - mean) ** 2, axis=(2, 3), keepdims=True)
    y = (y - mean) * jax.lax.rsqrt(var + eps)
    y = y * gamma.reshape(1, -1, 1, 1) + beta.reshape(1, -1, 1, 1)
    return jnp.maximum(y, 0.0)


if __name__ == "__main__":
    def run_case(key, N, Cin, H0, W0, Cout, K, upsample, stride):
        k_x, k_w, k_b, k_g, k_bt = jax.random.split(key, 5)
        x = jax.random.normal(k_x, (N, Cin, H0, W0), jnp.float32)
        w = 0.1 * jax.random.normal(k_w, (Cout, Cin, K, K), jnp.float32)
        b = 0.1 * jax.random.normal(k_b, (Cout,), jnp.float32)
        gamma = 1.0 + 0.1 * jax.random.normal(k_g, (Cout,), jnp.float32)
        beta = 0.1 * jax.random.normal(k_bt, (Cout,), jnp.float32)

        fn = make_upsample_conv_inst_relu(w, b, gamma, beta, in_shape=x.shape,
                                          upsample=upsample, stride=stride)
        out = jax.block_until_ready(fn(x))
        ref = _reference(x, w, b, gamma, beta, upsample=upsample, stride=stride)
        np.testing.assert_allclose(np.asarray(out), np.asarray(ref),
                                   atol=1e-4, rtol=1e-4)
        return out

    key = jax.random.PRNGKey(0)
    k1, k2 = jax.random.split(key)

    # Module config: UpsampleConvInstRelu(in=4, out=8, kernel=3, stride=1, upsample=2)
    out = run_case(k1, N=2, Cin=4, H0=16, W0=16, Cout=8, K=3, upsample=2, stride=1)
    assert out.shape == (2, 8, 32, 32)

    # Larger batch exercises multi-sample blocking (NB=4, grid=(2,)).
    out2 = run_case(k2, N=8, Cin=4, H0=16, W0=16, Cout=8, K=3, upsample=2, stride=1)
    assert out2.shape == (8, 8, 32, 32)

    print("KERNEL_OK")
</pallas_src>

<mosaic_0001>
module attributes {stable_mosaic.version = 11 : i64} {
  func.func @_conv_in_relu_kernel(%arg0: i32, %arg1: memref<1x16x64xf32, #tpu.memory_space<vmem>>, %arg2: memref<64x768xf32, #tpu.memory_space<vmem>>, %arg3: memref<32x48xf32, #tpu.memory_space<vmem>>, %arg4: memref<2x256xf32, #tpu.memory_space<vmem>>, %arg5: memref<256x8xf32, #tpu.memory_space<vmem>>, %arg6: memref<8x256xf32, #tpu.memory_space<vmem>>, %arg7: memref<1x32x256xf32, #tpu.memory_space<vmem>>) attributes {dimension_semantics = [#tpu.dimension_semantics<parallel>], iteration_bounds = array<i64: 2>, scalar_prefetch = 0 : i64, scratch_operands = 0 : i64, tpu.core_type = #tpu.core_type<tc>, window_params = [{transform_indices = @transform_0, window_bounds = array<i64: 1, 16, 64>}, {pipeline_mode = #tpu.pipeline_mode<synchronous>, transform_indices = @transform_1, window_bounds = array<i64: 64, 768>}, {pipeline_mode = #tpu.pipeline_mode<synchronous>, transform_indices = @transform_2, window_bounds = array<i64: 32, 48>}, {pipeline_mode = #tpu.pipeline_mode<synchronous>, transform_indices = @transform_3, window_bounds = array<i64: 2, 256>}, {pipeline_mode = #tpu.pipeline_mode<synchronous>, transform_indices = @transform_4, window_bounds = array<i64: 256, 8>}, {pipeline_mode = #tpu.pipeline_mode<synchronous>, transform_indices = @transform_5, window_bounds = array<i64: 8, 256>}, {transform_indices = @transform_6, window_bounds = array<i64: 1, 32, 256>}]} {
    %c0 = arith.constant 0 : index
    %c0_0 = arith.constant 0 : index
    %c0_1 = arith.constant 0 : index
    %0 = vector.load %arg1[%c0, %c0_0, %c0_1] : memref<1x16x64xf32, #tpu.memory_space<vmem>>, vector<1x16x64xf32>
    %1 = vector.shape_cast %0 : vector<1x16x64xf32> to vector<16x64xf32>
    %c0_2 = arith.constant 0 : index
    %c0_3 = arith.constant 0 : index
    %2 = vector.load %arg2[%c0_2, %c0_3] : memref<64x768xf32, #tpu.memory_space<vmem>>, vector<64x768xf32>
    %cst = arith.constant dense<0.000000e+00> : vector<16x768xf32>
    %3 = tpu.matmul %1, %2, %cst {dimension_numbers = #tpu.dot_dimension_numbers<[1], [0], [0], [1], [0, 0, 1, 1], [], []>} : vector<16x64xf32>, vector<64x768xf32>, vector<16x768xf32> -> vector<16x768xf32>
    %4 = vector.extract_strided_slice %3 {offsets = [0, 0], sizes = [16, 256], strides = [1, 1]} : vector<16x768xf32> to vector<16x256xf32>
    %5 = vector.extract_strided_slice %3 {offsets = [0, 256], sizes = [16, 256], strides = [1, 1]} : vector<16x768xf32> to vector<16x256xf32>
    %6 = vector.extract_strided_slice %3 {offsets = [0, 512], sizes = [16, 256], strides = [1, 1]} : vector<16x768xf32> to vector<16x256xf32>
    %7 = tpu.concatenate %4, %5, %6 in 0 : vector<16x256xf32>, vector<16x256xf32>, vector<16x256xf32> -> vector<48x256xf32>
    %c0_4 = arith.constant 0 : index
    %c0_5 = arith.constant 0 : index
    %8 = vector.load %arg3[%c0_4, %c0_5] : memref<32x48xf32, #tpu.memory_space<vmem>>, vector<32x48xf32>
    %cst_6 = arith.constant dense<0.000000e+00> : vector<32x256xf32>
    %9 = tpu.matmul %8, %7, %cst_6 {dimension_numbers = #tpu.dot_dimension_numbers<[1], [0], [0], [1], [0, 0, 1, 1], [], []>} : vector<32x48xf32>, vector<48x256xf32>, vector<32x256xf32> -> vector<32x256xf32>
    %10 = vector.shape_cast %9 : vector<32x256xf32> to vector<1x32x256xf32>
    %cst_7 = arith.constant dense<0.000000e+00> : vector<1x256xf32>
    %11 = vector.multi_reduction <add>, %10, %cst_7 [1] : vector<1x32x256xf32> to vector<1x256xf32>
    %12 = arith.mulf %10, %10 : vector<1x32x256xf32>
    %cst_8 = arith.constant dense<0.000000e+00> : vector<1x256xf32>
    %13 = vector.multi_reduction <add>, %12, %cst_8 [1] : vector<1x32x256xf32> to vector<1x256xf32>
    %14 = tpu.concatenate %11, %13 in 0 : vector<1x256xf32>, vector<1x256xf32> -> vector<2x256xf32>
    %c0_9 = arith.constant 0 : index
    %c0_10 = arith.constant 0 : index
    %15 = vector.load %arg5[%c0_9, %c0_10] : memref<256x8xf32, #tpu.memory_space<vmem>>, vector<256x8xf32>
    %cst_11 = arith.constant dense<0.000000e+00> : vector<2x8xf32>
    %16 = tpu.matmul %14, %15, %cst_11 {dimension_numbers = #tpu.dot_dimension_numbers<[1], [0], [0], [1], [0, 0, 1, 1], [], []>} : vector<2x256xf32>, vector<256x8xf32>, vector<2x8xf32> -> vector<2x8xf32>
    %c0_12 = arith.constant 0 : index
    %c0_13 = arith.constant 0 : index
    %17 = vector.load %arg6[%c0_12, %c0_13] : memref<8x256xf32, #tpu.memory_space<vmem>>, vector<8x256xf32>
    %cst_14 = arith.constant dense<0.000000e+00> : vector<2x256xf32>
    %18 = tpu.matmul %16, %17, %cst_14 {dimension_numbers = #tpu.dot_dimension_numbers<[1], [0], [0], [1], [0, 0, 1, 1], [], []>} : vector<2x8xf32>, vector<8x256xf32>, vector<2x256xf32> -> vector<2x256xf32>
    %19 = vector.extract_strided_slice %18 {offsets = [0, 0], sizes = [1, 256], strides = [1, 1]} : vector<2x256xf32> to vector<1x256xf32>
    %20 = vector.shape_cast %19 : vector<1x256xf32> to vector<1x1x256xf32>
    %21 = vector.extract_strided_slice %18 {offsets = [1, 0], sizes = [1, 256], strides = [1, 1]} : vector<2x256xf32> to vector<1x256xf32>
    %22 = vector.shape_cast %21 : vector<1x256xf32> to vector<1x1x256xf32>
    %23 = arith.mulf %20, %20 : vector<1x1x256xf32>
    %24 = arith.subf %22, %23 : vector<1x1x256xf32>
    %cst_15 = arith.constant 0.000000e+00 : f32
    %25 = vector.broadcast %cst_15 : f32 to vector<1x1x256xf32>
    %26 = arith.maximumf %24, %25 : vector<1x1x256xf32>
    %cst_16 = arith.constant 9.99999974E-6 : f32
    %27 = vector.broadcast %cst_16 : f32 to vector<1x1x256xf32>
    %28 = arith.addf %26, %27 : vector<1x1x256xf32>
    %29 = math.rsqrt %28 : vector<1x1x256xf32>
    %c0_17 = arith.constant 0 : index
    %c0_18 = arith.constant 0 : index
    %30 = vector.load %arg4[%c0_17, %c0_18] : memref<2x256xf32, #tpu.memory_space<vmem>>, vector<2x256xf32>
    %31 = vector.extract_strided_slice %30 {offsets = [0, 0], sizes = [1, 256], strides = [1, 1]} : vector<2x256xf32> to vector<1x256xf32>
    %32 = vector.shape_cast %31 : vector<1x256xf32> to vector<256xf32>
    %33 = vector.shape_cast %32 : vector<256xf32> to vector<1x1x256xf32>
    %34 = vector.extract_strided_slice %30 {offsets = [1, 0], sizes = [1, 256], strides = [1, 1]} : vector<2x256xf32> to vector<1x256xf32>
    %35 = vector.shape_cast %34 : vector<1x256xf32> to vector<256xf32>
    %36 = vector.shape_cast %35 : vector<256xf32> to vector<1x1x256xf32>
    %37 = vector.broadcast %20 : vector<1x1x256xf32> to vector<1x32x256xf32>
    %38 = arith.subf %10, %37 : vector<1x32x256xf32>
    %39 = arith.mulf %29, %33 : vector<1x1x256xf32>
    %40 = vector.broadcast %39 : vector<1x1x256xf32> to vector<1x32x256xf32>
    %41 = arith.mulf %38, %40 : vector<1x32x256xf32>
    %42 = vector.broadcast %36 : vector<1x1x256xf32> to vector<1x32x256xf32>
    %43 = arith.addf %41, %42 : vector<1x32x256xf32>
    %cst_19 = arith.constant 0.000000e+00 : f32
    %44 = vector.broadcast %cst_19 : f32 to vector<1x32x256xf32>
    %45 = arith.maximumf %43, %44 : vector<1x32x256xf32>
    %c0_20 = arith.constant 0 : index
    %c0_21 = arith.constant 0 : index
    %c0_22 = arith.constant 0 : index
    %46 = vector.load %arg7[%c0_20, %c0_21, %c0_22] : memref<1x32x256xf32, #tpu.memory_space<vmem>>, vector<1x32x256xf32>
    tpu.vector_store %arg7[%c0_20, %c0_21, %c0_22], %45 {strides = array<i32>} : memref<1x32x256xf32, #tpu.memory_space<vmem>>, vector<1x32x256xf32>,
    return
  }
  func.func @transform_0(%arg0: i32) -> (i32, i32, i32) {
    %c0_i32 = arith.constant 0 : i32
    %c0_i32_0 = arith.constant 0 : i32
    %c0_i32_1 = arith.constant 0 : i32
    return %arg0, %c0_i32, %c0_i32_0 : i32, i32, i32
  }
  func.func @transform_1(%arg0: i32) -> (i32, i32) {
    %c0_i32 = arith.constant 0 : i32
    %c0_i32_0 = arith.constant 0 : i32
    %c0_i32_1 = arith.constant 0 : i32
    return %c0_i32, %c0_i32_0 : i32, i32
  }
  func.func @transform_2(%arg0: i32) -> (i32, i32) {
    %c0_i32 = arith.constant 0 : i32
    %c0_i32_0 = arith.constant 0 : i32
    %c0_i32_1 = arith.constant 0 : i32
    return %c0_i32, %c0_i32_0 : i32, i32
  }
  func.func @transform_3(%arg0: i32) -> (i32, i32) {
    %c0_i32 = arith.constant 0 : i32
    %c0_i32_0 = arith.constant 0 : i32
    %c0_i32_1 = arith.constant 0 : i32
    return %c0_i32, %c0_i32_0 : i32, i32
  }
  func.func @transform_4(%arg0: i32) -> (i32, i32) {
    %c0_i32 = arith.constant 0 : i32
    %c0_i32_0 = arith.constant 0 : i32
    %c0_i32_1 = arith.constant 0 : i32
    return %c0_i32, %c0_i32_0 : i32, i32
  }
  func.func @transform_5(%arg0: i32) -> (i32, i32) {
    %c0_i32 = arith.constant 0 : i32
    %c0_i32_0 = arith.constant 0 : i32
    %c0_i32_1 = arith.constant 0 : i32
    return %c0_i32, %c0_i32_0 : i32, i32
  }
  func.func @transform_6(%arg0: i32) -> (i32, i32, i32) {
    %c0_i32 = arith.constant 0 : i32
    %c0_i32_0 = arith.constant 0 : i32
    %c0_i32_1 = arith.constant 0 : i32
    return %arg0, %c0_i32, %c0_i32_0 : i32, i32, i32
  }
}

</mosaic_0001>

<bundles_post_ra>
// kernel: apply.1
= control target key start
LH: loop header
LB: loop body
LE: loop exit
PB: predicated region body
PF: predicated region fallthrough
CT: control target
= control target key end

     0   :  { %11 = vsyncpa [#allocation3], 0  ;;  %s1588_s0 = inlined_call_operand.vmem [shape: f32[2,16,64], index: 0, kind: input, shape index: {}]   ;;  %s1589_s1 = inlined_call_operand.vmem [shape: f32[64,768], index: 1, kind: input, shape index: {}]   ;;  %s1590_s2 = inlined_call_operand.vmem [shape: f32[32,48], index: 2, kind: input, shape index: {}]   ;;  %s1591_s3 = inlined_call_operand.vmem [shape: f32[2,256], index: 3, kind: input, shape index: {}]   ;;  %s1592_s4 = inlined_call_operand.hbm [shape: f32[256,8], index: 4, kind: input, shape index: {}]   ;;  %s1593_s5 = inlined_call_operand.hbm [shape: f32[8,256], index: 5, kind: input, shape index: {}]   ;;  %s1594_s6 = inlined_call_operand.vmem [shape: f32[2,32,256], index: 6, kind: output, shape index: {}]  }
   0x1   :  { %12 = vsyncpa [#allocation5], 0  ;;  %s1288_s21 = smov 0  }
   0x2 LB: > { %s1294_s22 = sadd.s32 4294967295, %s1246_s21   ;;  %p1083_p0 = scmp.ge.s32.totalorder %s1246_s21, 1  ;;  %s1246_s21 = sphi %s1288_s21, %s18_s21  }
   0x3   : > { %p180_p1 = scmp.lt.s32.totalorder %s1246_s21, 3  ;;  %s1248_s23 = smov [#allocation2]  }
   0x4   : > { %s201_s24 = sshll.u32 %s1248_s23, 4  ;;  %p1159_p3 = scmp.eq.s32.totalorder %s1294_s22, 0  ;;  %s202_s24 = int_to_ptr.vmem [resolvable:$true] %s201_s24 }
   0x5   : > { %p1298_p2 = pnand %p1083_p0, %p180_p1  ;;  %s1249_s26 = smov [#allocation4]  }
   0x6   : > { %s215_s27 = sshll.u32 %s1249_s26, 4  ;;  %s1191_s29 = scalar_lea.vmem %s202_s24, 4096  ;;  %s216_s27 = int_to_ptr.vmem [resolvable:$true] %s215_s27 }
   0x7   : > { %p1152_p4 = pneg %p1298_p2  ;;  %p1192_p7 = scmp.ne.s32.totalorder %s202_s24, %s1191_s29 }
   0x8   : > { %p1199_p10 = scmp.lt.s32.totalorder %s202_s24, %s202_s24  ;;  %p1200_p11 = scmp.lt.s32.totalorder %s1191_s29, %s1191_s29 }
   0x9   : > { %p1307_p5 = pnand %p1159_p3, %p1152_p4 }
   0xa   : > { %p1201_p12 = por %p1200_p11, %p1199_p10 }
   0xb   : > { %p1182_p6 = pneg %p1307_p5 }
   0xd   : > { %p1194_p8 = pnand %p1192_p7, %p1182_p6 }
   0xf   : > { %p1195_p9 = pneg %p1194_p8 }
  0x11   : > { %p1202_p13 = pnand %p1201_p12, %p1195_p9 }
  0x13   : > { %1205 = shalt.err (!%p1202_p13)
}
  0x14   : > { %s1250_s30 = smov 128   ;;  %s1251_s7 = smov 8  }
  0x15   : > { %1155 = dma.hbm_to_vmem [thread:$0]  (!%p1307_p5), %s1592_s4, 4096, %s202_s24, [#allocation3], %s1250_s30, %s1250_s30, %s1251_s7  }
  0x16   : > { %s1217_s10 = scalar_lea.vmem %s216_s27, 256  ;;  %p1225_p7 = scmp.lt.s32.totalorder %s216_s27, %s216_s27 }
  0x17   : > { %p1218_p0 = scmp.ne.s32.totalorder %s216_s27, %s1217_s10  ;;  %p1226_p8 = scmp.lt.s32.totalorder %s1217_s10, %s1217_s10 }
  0x19   : > { %p1220_p1 = pnand %p1218_p0, %p1182_p6  ;;  %p1227_p10 = por %p1226_p8, %p1225_p7 }
  0x1b   : > { %p1221_p4 = pneg %p1220_p1 }
  0x1d   : > { %p1228_p9 = pnand %p1227_p10, %p1221_p4 }
  0x1f   : > { %1231 = shalt.err (!%p1228_p9)
}
  0x20   : > { %1158 = dma.hbm_to_vmem [thread:$0]  (!%p1307_p5), %s1593_s5, 256, %s216_s27, [#allocation5]  }
  0x21   : > { %236 = sbr.rel (%p1298_p2) target bundleno = 956 (0x3bc), region = 44 }
  0x26   : > { %1237 = dma.done.wait (%p1159_p3), [#allocation3], 4096  }
  0x27   : > { %1239 = vsyncadd (%p1159_p3), [#allocation3], 4294963200 }
  0x28   : > { %1241 = dma.done.wait (%p1159_p3), [#allocation5], 256  }
  0x29   : > { %1243 = vsyncadd (%p1159_p3), [#allocation5], 4294967040  ;;  %v1252_v0 = vmov 0.0   ;;  %v325_v1 = vld [vmem:[%s1589_s1 + $0x158] sm:$0xff]  ;;  %v324_v2 = vld [vmem:[%s1589_s1 + $0x150] sm:$0xff]  ;;  %p270_p2 = scmp.lt.s32.totalorder %s1294_s22, 1 }
  0x2a   : > { %401 = vmatprep.mubr.f32.mxu0 %v1252_v0  ;;  %649 = vmatprep.mubr.f32.mxu1 %v1252_v0  ;;  %v319_v3 = vld [vmem:[%s1589_s1 + $0x128] sm:$0xff]  ;;  %v318_v4 = vld [vmem:[%s1589_s1 + $0x120] sm:$0xff]  ;;  %v313_v5 = vld [vmem:[%s1589_s1 + $0xf8] sm:$0xff]  ;;  %vm330_vm0 = vcmask 523264   ;;  %vm572_vm1 = vcmask 392192   ;;  %vm718_vm2 = vcmask 1040384  }
  0x2b   : > { %353 = vmatprep.subr.mxu0 %v325_v1  ;;  %v312_v6 = vld [vmem:[%s1589_s1 + $0xf0] sm:$0xff]  ;;  %v307_v7 = vld [vmem:[%s1589_s1 + $0xc8] sm:$0xff]  ;;  %s1598_s22 = smov (!%p270_p2, %s1294_s22), 1  ;;  %v306_v8 = vld [vmem:[%s1589_s1 + $0xc0] sm:$0xff]  ;;  %vm825_vm3 = vcmask 64512  }
  0x2c   : > { %354 = vmatpush1.msra.mxu0 %v324_v2  ;;  %v301_v9 = vld [vmem:[%s1589_s1 + $0x98] sm:$0xff]  ;;  %v300_v10 = vld [vmem:[%s1589_s1 + $0x90] sm:$0xff]  ;;  %v295_v11 = vld [vmem:[%s1589_s1 + $0x68] sm:$0xff]  ;;  %s1107_s13 = sshll.u32 %s1598_s22, 4 }
  0x2d   : > { %355 = vmatprep.subr.mxu0 %v319_v3  ;;  %v294_v12 = vld [vmem:[%s1589_s1 + $0x60] sm:$0xff]  ;;  %v289_v13 = vld [vmem:[%s1589_s1 + $0x38] sm:$0xff]  ;;  %v288_v14 = vld [vmem:[%s1589_s1 + $0x30] sm:$0xff]  ;;  %s274_s24 = scalar_lea.vmem %s1588_s0, %s1107_s13  ;;  %s1108_s13 = sshll.u32 %s1598_s22, 6 }
  0x2e   : > { %356 = vmatpush1.msra.mxu0 %v318_v4  ;;  %v283_v15 = vld [vmem:[%s1589_s1 + $0x8] sm:$0xff]  ;;  %v282_v16 = vld [vmem:[%s1589_s1] sm:$0xff]  ;;  %v321_v20 = vld [vmem:[%s1589_s1 + $0x138] sm:$0xff]  ;;  %s279_s16 = scalar_lea.vmem %s1594_s6, %s1108_s13 }
  0x2f   : > { %357 = vmatprep.subr.mxu0 %v313_v5  ;;  %v1397_v17 = vld [vmem:[%s274_s24] sm:$0xff]  ;;  %v327_v18 = vld [vmem:[%s1589_s1 + $0x168] sm:$0xff]  ;;  %v320_v21 = vld [vmem:[%s1589_s1 + $0x130] sm:$0xff] }
  0x30   : > { %358 = vmatpush1.msra.mxu0 %v312_v6  ;;  %v326_v19 = vld [vmem:[%s1589_s1 + $0x160] sm:$0xff]  ;;  %v315_v22 = vld [vmem:[%s1589_s1 + $0x108] sm:$0xff]  ;;  %v309_v25 = vld [vmem:[%s1589_s1 + $0xd8] sm:$0xff] }
  0x31   : > { %359 = vmatprep.subr.mxu0 %v307_v7  ;;  %v1417_v23 = vld [vmem:[%s274_s24 + $0x8] sm:$0xff]  ;;  %v314_v24 = vld [vmem:[%s1589_s1 + $0x100] sm:$0xff]  ;;  %v308_v26 = vld [vmem:[%s1589_s1 + $0xd0] sm:$0xff] }
  0x32   : > { %360 = vmatpush1.msra.mxu0 %v306_v8  ;;  %v303_v27 = vld [vmem:[%s1589_s1 + $0xa8] sm:$0xff]  ;;  %v302_v28 = vld [vmem:[%s1589_s1 + $0xa0] sm:$0xff]  ;;  %v297_v29 = vld [vmem:[%s1589_s1 + $0x78] sm:$0xff] }
  0x33   : > { %361 = vmatprep.subr.mxu0 %v301_v9  ;;  %v296_v30 = vld [vmem:[%s1589_s1 + $0x70] sm:$0xff]  ;;  %v291_v31 = vld [vmem:[%s1589_s1 + $0x48] sm:$0xff]  ;;  %v290_v32 = vld [vmem:[%s1589_s1 + $0x40] sm:$0xff] }
  0x34   : > { %362 = vmatpush1.msra.mxu0 %v300_v10  ;;  %v285_v33 = vld [vmem:[%s1589_s1 + $0x18] sm:$0xff]  ;;  %v284_v34 = vld [vmem:[%s1589_s1 + $0x10] sm:$0xff]  ;;  %v323_v37 = vld [vmem:[%s1589_s1 + $0x148] sm:$0xff] }
  0x35   : > { %363 = vmatprep.subr.mxu0 %v295_v11  ;;  %v329_v35 = vld [vmem:[%s1589_s1 + $0x178] sm:$0xff]  ;;  %v328_v36 = vld [vmem:[%s1589_s1 + $0x170] sm:$0xff]  ;;  %v322_v38 = vld [vmem:[%s1589_s1 + $0x140] sm:$0xff] }
  0x36   : > { %364 = vmatpush1.msra.mxu0 %v294_v12  ;;  %v317_v39 = vld [vmem:[%s1589_s1 + $0x118] sm:$0xff]  ;;  %v316_v40 = vld [vmem:[%s1589_s1 + $0x110] sm:$0xff]  ;;  %v311_v41 = vld [vmem:[%s1589_s1 + $0xe8] sm:$0xff] }
  0x37   : > { %365 = vmatprep.subr.mxu0 %v289_v13  ;;  %v310_v42 = vld [vmem:[%s1589_s1 + $0xe0] sm:$0xff]  ;;  %v305_v43 = vld [vmem:[%s1589_s1 + $0xb8] sm:$0xff]  ;;  %v304_v44 = vld [vmem:[%s1589_s1 + $0xb0] sm:$0xff] }
  0x38   : > { %366 = vmatpush1.msra.mxu0 %v288_v14  ;;  %v299_v45 = vld [vmem:[%s1589_s1 + $0x88] sm:$0xff]  ;;  %v298_v46 = vld [vmem:[%s1589_s1 + $0x80] sm:$0xff]  ;;  %v293_v47 = vld [vmem:[%s1589_s1 + $0x58] sm:$0xff] }
  0x39   : > { %367 = vmatprep.subr.mxu0 %v283_v15  ;;  %v292_v48 = vld [vmem:[%s1589_s1 + $0x50] sm:$0xff]  ;;  %v287_v49 = vld [vmem:[%s1589_s1 + $0x28] sm:$0xff]  ;;  %v286_v50 = vld [vmem:[%s1589_s1 + $0x20] sm:$0xff] }
  0x3a   : > { %368 = vmatpush1.msra.mxu0 %v282_v16  ;;  %v568_v63 = vld [vmem:[%s1590_s2] sm:$0xff]  ;;  %v569_v1 = vld [vmem:[%s1590_s2 + $0x8] sm:$0xff]  ;;  %v570_v2 = vld [vmem:[%s1590_s2 + $0x10] sm:$0xff] }
  0x3b   : > { %1094 = vmatmul.mubr.msk.f32.vlgmr.msra.gmra.mxu0 %vm330_vm0, %v1397_v17  ;;  %430 = vmatprep.subr.mxu0 %v327_v18  ;;  %v571_v3 = vld [vmem:[%s1590_s2 + $0x18] sm:$0xff]  ;;  %v751_v6 = vld [vmem:[#allocation2 + $0xf0] sm:$0xff]  ;;  %v750_v8 = vld [vmem:[#allocation2 + $0xe8] sm:$0xff] }
  0x3c   : > { %431 = vmatpush1.msra.mxu0 %v326_v19  ;;  %407 = vmatprep.mubr.f32.mxu0 %v1252_v0  ;;  %v752_v4 = vld [vmem:[#allocation2 + $0xf8] sm:$0xff]  ;;  %v735_v7 = vld [vmem:[#allocation2 + $0x70] sm:$0xff]  ;;  %v734_v9 = vld [vmem:[#allocation2 + $0x68] sm:$0xff] }
  0x3d   : > { %432 = vmatprep.subr.mxu0 %v321_v20  ;;  %v736_v5 = vld [vmem:[#allocation2 + $0x78] sm:$0xff]  ;;  %v749_v10 = vld [vmem:[#allocation2 + $0xe0] sm:$0xff]  ;;  %v747_v14 = vld [vmem:[#allocation2 + $0xd0] sm:$0xff] }
  0x3e   : > { %433 = vmatpush1.msra.mxu0 %v320_v21  ;;  %v733_v11 = vld [vmem:[#allocation2 + $0x60] sm:$0xff]  ;;  %v748_v12 = vld [vmem:[#allocation2 + $0xd8] sm:$0xff]  ;;  %v731_v15 = vld [vmem:[#allocation2 + $0x50] sm:$0xff] }
  0x3f   : > { %434 = vmatprep.subr.mxu0 %v315_v22  ;;  %1095 = vmatmul.mubr.msk.f32.gmra.mxu0 %vm330_vm0, %v1417_v23  ;;  %v732_v13 = vld [vmem:[#allocation2 + $0x58] sm:$0xff]  ;;  %v746_v16 = vld [vmem:[#allocation2 + $0xc8] sm:$0xff]  ;;  %v745_v18 = vld [vmem:[#allocation2 + $0xc0] sm:$0xff] }
  0x40   : > { %435 = vmatpush1.msra.mxu0 %v314_v24  ;;  %478 = vmatprep.mubr.f32.mxu0 %v1252_v0  ;;  %v729_v19 = vld [vmem:[#allocation2 + $0x40] sm:$0xff]  ;;  %v744_v20 = vld [vmem:[#allocation2 + $0xb8] sm:$0xff]  ;;  %v743_v22 = vld [vmem:[#allocation2 + $0xb0] sm:$0xff] }
  0x41   : > { %436 = vmatprep.subr.mxu0 %v309_v25  ;;  %v728_v21 = vld [vmem:[#allocation2 + $0x38] sm:$0xff]  ;;  %v742_v24 = vld [vmem:[#allocation2 + $0xa8] sm:$0xff] }
  0x42   : > { %437 = vmatpush1.msra.mxu0 %v308_v26  ;;  %v726_v25 = vld [vmem:[#allocation2 + $0x28] sm:$0xff]  ;;  %v741_v26 = vld [vmem:[#allocation2 + $0xa0] sm:$0xff] }
  0x43   : > { %438 = vmatprep.subr.mxu0 %v303_v27  ;;  %v725_v27 = vld [vmem:[#allocation2 + $0x20] sm:$0xff] }
  0x44   : > { %439 = vmatpush1.msra.mxu0 %v302_v28  ;;  %v740_v28 = vld [vmem:[#allocation2 + $0x98] sm:$0xff] }
  0x45   : > { %440 = vmatprep.subr.mxu0 %v297_v29  ;;  %v724_v29 = vld [vmem:[#allocation2 + $0x18] sm:$0xff] }
  0x46   : > { %441 = vmatpush1.msra.mxu0 %v296_v30  ;;  %v739_v30 = vld [vmem:[#allocation2 + $0x90] sm:$0xff] }
  0x47   : > { %442 = vmatprep.subr.mxu0 %v291_v31  ;;  %v723_v31 = vld [vmem:[#allocation2 + $0x10] sm:$0xff] }
  0x48   : > { %443 = vmatpush1.msra.mxu0 %v290_v32  ;;  %v738_v32 = vld [vmem:[#allocation2 + $0x88] sm:$0xff] }
  0x49   : > { %444 = vmatprep.subr.mxu0 %v285_v33  ;;  %v722_v33 = vld [vmem:[#allocation2 + $0x8] sm:$0xff] }
  0x4a   : > { %445 = vmatpush1.msra.mxu0 %v284_v34  ;;  %v737_v34 = vld [vmem:[#allocation2 + $0x80] sm:$0xff] }
  0x4b   : > { %1096 = vmatmul.mubr.msk.f32.vlgmr.msra.gmra.mxu0 %vm330_vm0, %v1397_v17  ;;  %507 = vmatprep.subr.mxu0 %v329_v35  ;;  %v721_v35 = vld [vmem:[#allocation2] sm:$0xff] }
  0x4c   : > { %508 = vmatpush1.msra.mxu0 %v328_v36  ;;  %484 = vmatprep.mubr.f32.mxu0 %v1252_v0 }
  0x4d   : > { %509 = vmatprep.subr.mxu0 %v323_v37 }
  0x4e   : > { %510 = vmatpush1.msra.mxu0 %v322_v38 }
  0x4f   : > { %511 = vmatprep.subr.mxu0 %v317_v39  ;;  %1097 = vmatmul.mubr.msk.f32.gmra.mxu0 %vm330_vm0, %v1417_v23 }
  0x50   : > { %512 = vmatpush1.msra.mxu0 %v316_v40  ;;  %555 = vmatprep.mubr.f32.mxu0 %v1252_v0 }
  0x51   : > { %513 = vmatprep.subr.mxu0 %v311_v41 }
  0x52   : > { %514 = vmatpush1.msra.mxu0 %v310_v42 }
  0x53   : > { %515 = vmatprep.subr.mxu0 %v305_v43 }
  0x54   : > { %516 = vmatpush1.msra.mxu0 %v304_v44 }
  0x55   : > { %517 = vmatprep.subr.mxu0 %v299_v45 }
  0x56   : > { %518 = vmatpush1.msra.mxu0 %v298_v46 }
  0x57   : > { %519 = vmatprep.subr.mxu0 %v293_v47 }
  0x58   : > { %520 = vmatpush1.msra.mxu0 %v292_v48 }
  0x59   : > { %521 = vmatprep.subr.mxu0 %v287_v49 }
  0x5a   : > { %522 = vmatpush1.msra.mxu0 %v286_v50 }
  0x5b   : > { %1098 = vmatmul.mubr.msk.f32.vlgmr.msra.gmra.mxu0 %vm330_vm0, %v1397_v17  ;;  %v730_v17 = vld [vmem:[#allocation2 + $0x48] sm:$0xff] }
  0x5c   : > { %561 = vmatprep.mubr.f32.mxu0 %v1252_v0 }
  0x5f   : > { %1099 = vmatmul.mubr.msk.f32.gmra.mxu0 %vm330_vm0, %v1417_v23  ;;  %v727_v23 = vld [vmem:[#allocation2 + $0x30] sm:$0xff] }
  0xfb   : > { %v403_v51 = vpop.f32.mrf.mxu0 }
  0xfd   : > { %v405_v52 = vpop.f32.mrf.mxu0 }
  0xff   : > { %v409_v53 = vpop.f32.mrf.mxu0 }
 0x101   : > { %v411_v54 = vpop.f32.mrf.mxu0 }
 0x10b   : > { %v480_v55 = vpop.f32.mrf.mxu0 }
 0x10d   : > { %v482_v56 = vpop.f32.mrf.mxu0 }
 0x10f   : > { %v486_v57 = vpop.f32.mrf.mxu0 }
 0x111   : > { %v488_v58 = vpop.f32.mrf.mxu0 }
 0x11b   : > { %v557_v59 = vpop.f32.mrf.mxu0 }
 0x11d   : > { %v559_v60 = vpop.f32.mrf.mxu0 }
 0x11f   : > { %v563_v61 = vpop.f32.mrf.mxu0 }
 0x121   : > { %v565_v62 = vpop.f32.mrf.mxu0 }
 0x122   : > { %605 = vmatprep.subr.mxu1 %v565_v62 }
 0x123   : > { %606 = vmatpush1.msra.mxu1 %v563_v61 }
 0x124   : > { %607 = vmatprep.subr.mxu1 %v559_v60 }
 0x125   : > { %608 = vmatpush1.msra.mxu1 %v557_v59 }
 0x126   : > { %609 = vmatprep.subr.mxu1 %v488_v58 }
 0x127   : > { %610 = vmatpush1.msra.mxu1 %v486_v57 }
 0x128   : > { %611 = vmatprep.subr.mxu1 %v482_v56 }
 0x129   : > { %612 = vmatpush1.msra.mxu1 %v480_v55 }
 0x12a   : > { %613 = vmatprep.subr.mxu1 %v411_v54 }
 0x12b   : > { %614 = vmatpush1.msra.mxu1 %v409_v53 }
 0x12c   : > { %615 = vmatprep.subr.mxu1 %v405_v52 }
 0x12d   : > { %616 = vmatpush1.msra.mxu1 %v403_v51 }
 0x12e   : > { %1100 = vmatmul.mubr.msk.f32.vlgmr.msra.gmra.mxu1 %vm572_vm1, %v568_v63  ;;  %1109 = vmatprep.subr.mxu1 %v752_v4 }
 0x12f   : > { %655 = vmatprep.mubr.f32.mxu1 %v1252_v0  ;;  %1110 = vmatpush3.msra.mxu1 %v736_v5 }
 0x130   : > { %1111 = vmatprep.subr.mxu1 %v751_v6 }
 0x131   : > { %1112 = vmatpush3.msra.mxu1 %v735_v7 }
 0x132   : > { %1101 = vmatmul.mubr.msk.f32.gmra.mxu1 %vm572_vm1, %v569_v1  ;;  %1113 = vmatprep.subr.mxu1 %v750_v8 }
 0x133   : > { %661 = vmatprep.mubr.f32.mxu1 %v1252_v0  ;;  %1114 = vmatpush3.msra.mxu1 %v734_v9 }
 0x134   : > { %1115 = vmatprep.subr.mxu1 %v749_v10 }
 0x135   : > { %1116 = vmatpush3.msra.mxu1 %v733_v11 }
 0x136   : > { %1102 = vmatmul.mubr.msk.f32.gmra.mxu1 %vm572_vm1, %v570_v2  ;;  %1117 = vmatprep.subr.mxu1 %v748_v12 }
 0x137   : > { %667 = vmatprep.mubr.f32.mxu1 %v1252_v0  ;;  %1118 = vmatpush3.msra.mxu1 %v732_v13 }
 0x138   : > { %1119 = vmatprep.subr.mxu1 %v747_v14 }
 0x139   : > { %1120 = vmatpush3.msra.mxu1 %v731_v15 }
 0x13a   : > { %1103 = vmatmul.mubr.msk.f32.gmra.mxu1 %vm572_vm1, %v571_v3  ;;  %1121 = vmatprep.subr.mxu1 %v746_v16 }
 0x13b   : > { %1122 = vmatpush3.msra.mxu1 %v730_v17 }
 0x13c   : > { %1123 = vmatprep.subr.mxu1 %v745_v18 }
 0x13d   : > { %1124 = vmatpush3.msra.mxu1 %v729_v19 }
 0x13e   : > { %1125 = vmatprep.subr.mxu1 %v744_v20 }
 0x13f   : > { %1126 = vmatpush3.msra.mxu1 %v728_v21 }
 0x140   : > { %1127 = vmatprep.subr.mxu1 %v743_v22 }
 0x141   : > { %1128 = vmatpush3.msra.mxu1 %v727_v23 }
 0x142   : > { %1129 = vmatprep.subr.mxu1 %v742_v24 }
 0x143   : > { %1130 = vmatpush3.msra.mxu1 %v726_v25 }
 0x144   : > { %1131 = vmatprep.subr.mxu1 %v741_v26 }
 0x145   : > { %1132 = vmatpush3.msra.mxu1 %v725_v27  ;;  %v824_v27 = vld [vmem:[#allocation4 + $0x8] sm:$0xff] }
 0x146   : > { %1133 = vmatprep.subr.mxu1 %v740_v28  ;;  %v823_v28 = vld [vmem:[#allocation4] sm:$0xff] }
 0x147   : > { %1134 = vmatpush3.msra.mxu1 %v724_v29 }
 0x148   : > { %1135 = vmatprep.subr.mxu1 %v739_v30 }
 0x149   : > { %1136 = vmatpush3.msra.mxu1 %v723_v31 }
 0x14a   : > { %1137 = vmatprep.subr.mxu1 %v738_v32 }
 0x14b   : > { %1138 = vmatpush3.msra.mxu1 %v722_v33 }
 0x14c   : > { %1139 = vmatprep.subr.mxu1 %v737_v34 }
 0x14d   : > { %1140 = vmatpush3.msra.mxu1 %v721_v35 }
 0x14e   : > { %859 = vmatprep.subr.mxu1 %v824_v27 }
 0x1ee   : > { %v1529_v36 = vpop.f32.mrf.mxu1 }
 0x1ef   : > { %v692_v43 = vmul.f32 %v1529_v36, %v1529_v36 }
 0x1f0   : > { %v1531_v37 = vpop.f32.mrf.mxu1 }
 0x1f1   : > { %v693_v46 = vmul.f32 %v1531_v37, %v1531_v37 }
 0x1f2   : > { %v1533_v38 = vpop.f32.mrf.mxu1 }
 0x1f3   : > { %v694_v40 = vmul.f32 %v1533_v38, %v1533_v38  ;;  %v674_v44 = vadd.f32 %v1533_v38, %v1529_v36 }
 0x1f4   : > { %v1535_v39 = vpop.f32.mrf.mxu1 }
 0x1f5   : > { %v695_v41 = vmul.f32 %v1535_v39, %v1535_v39  ;;  %v700_v48 = vadd.f32 %v694_v40, %v692_v43  ;;  %v683_v49 = vadd.f32 %v1535_v39, %v1531_v37 }
 0x1f6   : > { %v1541_v42 = vpop.f32.mrf.mxu1 }
 0x1f7   : > { %v696_v45 = vmul.f32 %v1541_v42, %v1541_v42  ;;  %v675_v50 = vadd.f32 %v674_v44, %v1541_v42  ;;  %v709_v52 = vadd.f32 %v695_v41, %v693_v46 }
 0x1f8   : > { %v1551_v47 = vpop.f32.mrf.mxu1 }
 0x1f9   : > { %v697_v51 = vmul.f32 %v1551_v47, %v1551_v47  ;;  %v701_v54 = vadd.f32 %v700_v48, %v696_v45  ;;  %v684_v55 = vadd.f32 %v683_v49, %v1551_v47 }
 0x1fa   : > { %v1558_v53 = vpop.f32.mrf.mxu1 }
 0x1fb   : > { %v676_v56 = vadd.f32 %v675_v50, %v1558_v53  ;;  %v698_v57 = vmul.f32 %v1558_v53, %v1558_v53  ;;  %v710_v58 = vadd.f32 %v709_v52, %v697_v51  ;;  %v916_v51 = vld [vmem:[%s1591_s3] sm:$0xf] }
 0x1fc   : > { %v1564_v59 = vpop.f32.mrf.mxu1 }
 0x1fd   : > { %v677_v60 = vrot.slane %v676_v56, 4  ;;  %v702_v61 = vadd.f32 %v701_v54, %v698_v57  ;;  %v685_v62 = vadd.f32 %v684_v55, %v1564_v59  ;;  %v699_v63 = vmul.f32 %v1564_v59, %v1564_v59 }
 0x1ff   : > { %v678_v1 = vadd.f32 %v677_v60, %v676_v56  ;;  %v703_v2 = vrot.slane %v702_v61, 4  ;;  %v686_v3 = vrot.slane %v685_v62, 4  ;;  %v711_v4 = vadd.f32 %v710_v58, %v699_v63 }
 0x201   : > { %v679_v5 = vrot.slane %v678_v1, 2  ;;  %v704_v6 = vadd.f32 %v703_v2, %v702_v61  ;;  %v687_v7 = vadd.f32 %v686_v3, %v685_v62  ;;  %v712_v8 = vrot.slane %v711_v4, 4 }
 0x203   : > { %v705_v9 = vrot.slane %v704_v6, 2  ;;  %v688_v10 = vrot.slane %v687_v7, 2  ;;  %v713_v11 = vadd.f32 %v712_v8, %v711_v4  ;;  %v680_v12 = vadd.f32 %v679_v5, %v678_v1 }
 0x205   : > { %v706_v13 = vadd.f32 %v705_v9, %v704_v6  ;;  %v689_v14 = vadd.f32 %v688_v10, %v687_v7  ;;  %v714_v15 = vrot.slane %v713_v11, 2  ;;  %v681_v19 = vrot.slane %v680_v12, 1 }
 0x207   : > { %v707_v16 = vrot.slane %v706_v13, 1  ;;  %v690_v17 = vrot.slane %v689_v14, 1  ;;  %v715_v18 = vadd.f32 %v714_v15, %v713_v11  ;;  %v682_v24 = vadd.f32 %v681_v19, %v680_v12 }
 0x209   : > { %v716_v20 = vrot.slane %v715_v18, 1  ;;  %v708_v21 = vadd.f32 %v707_v16, %v706_v13  ;;  %v691_v22 = vadd.f32 %v690_v17, %v689_v14 }
 0x20b   : > { %v717_v23 = vadd.f32 %v716_v20, %v715_v18  ;;  %v719_v26 = vsel %vm718_vm2, %v682_v24, %v708_v21 }
 0x20d   : > { %v720_v25 = vsel %vm718_vm2, %v691_v22, %v717_v23 }
 0x20e   : > { %817 = vmatprep.mubr.f32.mxu1 %v720_v25 }
 0x20f   : > { %818 = vmatmul.mubr.f32.vlgmr.msra.gmra.mxu1 %v719_v26 }
 0x210   : > { %893 = vmatprep.mubr.f32.mxu1 %v1252_v0  ;;  %860 = vmatpush1.msra.mxu1 %v823_v28  ;;  %v917_v0 = vlaneseq }
 0x212   : > { %v918_v50 = vshrl.u32 %v917_v0, 7 }
 0x214   : > { %v919_v52 = vsub.s32 0, %v918_v50  ;;  %v948_v54 = vsub.s32 1, %v918_v50  ;;  %v968_v55 = vsub.s32 3, %v918_v50  ;;  %v940_v56 = vsub.s32 2, %v918_v50 }
 0x216   : > { %v937_v57 = vrot.slane %v916_v51, %v919_v52  ;;  %v965_v60 = vrot.slane %v916_v51, %v948_v54  ;;  %v969_v62 = vrot.slane %v916_v51, %v968_v55  ;;  %v941_v1 = vrot.slane %v916_v51, %v940_v56 }
 0x218   : > { %v975_v4 = vrot.slane %v965_v60, %v948_v54  ;;  %v979_v12 = vrot.slane %v969_v62, %v948_v54 }
 0x2cf   : > { %v1141_v29 = vpop.f32.mrf.mxu1 }
 0x2d1   : > { %v1142_v30 = vpop.f32.mrf.mxu1 }
 0x2d2   : > { %v1143_v31 = vadd.f32 %v1142_v30, %v1141_v29 }
 0x2d4   : > { %1104 = vmatmul.mubr.msk.f32.vlgmr.msra.gmra.mxu1 %vm825_vm3, %v1143_v31 }
 0x394   : > { %v895_v32 = vpop.f32.mrf.mxu1 }
 0x395   : > { %v900_v33 = vmul.f32 %v895_v32, %v895_v32  ;;  %v920_v58 = vrot.slane %v895_v32, %v919_v52 }
 0x396   : > { %v897_v34 = vpop.f32.mrf.mxu1 }
 0x397   : > { %v904_v35 = vrot.slane %v900_v33, 7  ;;  %v901_v40 = vmul.f32 %v897_v34, %v897_v34  ;;  %v924_v63 = vrot.slane %v897_v34, %v919_v52  ;;  %v925_v3 = vsub.f32 %v1529_v36, %v920_v58 }
 0x398   : > { %v927_v6 = vsub.f32 %v1533_v38, %v920_v58  ;;  %v929_v7 = vsub.f32 %v1541_v42, %v920_v58  ;;  %v931_v8 = vsub.f32 %v1558_v53, %v920_v58 }
 0x399   : > { %v908_v41 = vsub.f32 %v895_v32, %v904_v35  ;;  %v905_v43 = vrot.slane %v901_v40, 7  ;;  %v926_v10 = vsub.f32 %v1531_v37, %v924_v63  ;;  %v928_v36 = vsub.f32 %v1535_v39, %v924_v63 }
 0x39a   : > { %v930_v17 = vsub.f32 %v1551_v47, %v924_v63  ;;  %v932_v38 = vsub.f32 %v1564_v59, %v924_v63 }
 0x39b   : > { %v910_v44 = vmax.f32 %v908_v41, 0.0  ;;  %v909_v45 = vsub.f32 %v897_v34, %v905_v43 }
 0x39d   : > { %v912_v46 = vadd.f32 1e-05, %v910_v44  ;;  %v911_v48 = vmax.f32 %v909_v45, 0.0 }
 0x39f   : > { %1176 = vrsqrt.f32 %v912_v46  ;;  %v913_v49 = vadd.f32 1e-05, %v911_v48 }
 0x3a1   : > { %1178 = vrsqrt.f32 %v913_v49 }
 0x3ac   : > { %v1177_v61 = vpop.eup %1176 }
 0x3ad   : > { %v944_v2 = vmul.f32 %v1177_v61, %v937_v57 }
 0x3ae   : > { %v1179_v5 = vpop.eup %1178 }
 0x3af   : > { %v949_v9 = vrot.slane %v944_v2, %v948_v54  ;;  %v945_v11 = vmul.f32 %v1179_v5, %v941_v1 }
 0x3b1   : > { %v954_v13 = vmul.f32 %v949_v9, %v925_v3  ;;  %v956_v14 = vmul.f32 %v949_v9, %v927_v6  ;;  %v958_v15 = vmul.f32 %v949_v9, %v929_v7  ;;  %v960_v16 = vmul.f32 %v949_v9, %v931_v8 }
 0x3b2   : > { %v953_v18 = vrot.slane %v945_v11, %v948_v54 }
 0x3b3   : > { %v980_v42 = vadd.f32 %v975_v4, %v954_v13  ;;  %v982_v19 = vadd.f32 %v975_v4, %v956_v14  ;;  %v984_v53 = vadd.f32 %v975_v4, %v958_v15  ;;  %v986_v20 = vadd.f32 %v975_v4, %v960_v16 }
 0x3b4   : > { %v955_v37 = vmul.f32 %v953_v18, %v926_v10  ;;  %v957_v21 = vmul.f32 %v953_v18, %v928_v36  ;;  %v959_v22 = vmul.f32 %v953_v18, %v930_v17  ;;  %v961_v23 = vmul.f32 %v953_v18, %v932_v38 }
 0x3b5   : > { %v988_v24 = vmax.f32 %v980_v42, 0.0  ;;  %v990_v25 = vmax.f32 %v982_v19, 0.0  ;;  %v992_v39 = vmax.f32 %v984_v53, 0.0  ;;  %v994_v26 = vmax.f32 %v986_v20, 0.0 }
 0x3b6   : > { %v981_v47 = vadd.f32 %v979_v12, %v955_v37  ;;  %v983_v27 = vadd.f32 %v979_v12, %v957_v21  ;;  %v985_v59 = vadd.f32 %v979_v12, %v959_v22  ;;  %v987_v28 = vadd.f32 %v979_v12, %v961_v23 }
 0x3b7   : > { %996 = vst [vmem:[%s279_s16] sm:$0xff] %v988_v24  ;;  %998 = vst [vmem:[%s279_s16 + $0x10] sm:$0xff] %v990_v25 }
 0x3b8   : > { %1000 = vst [vmem:[%s279_s16 + $0x20] sm:$0xff] %v992_v39  ;;  %1002 = vst [vmem:[%s279_s16 + $0x30] sm:$0xff] %v994_v26  ;;  %v989_v29 = vmax.f32 %v981_v47, 0.0  ;;  %v991_v30 = vmax.f32 %v983_v27, 0.0  ;;  %v993_v31 = vmax.f32 %v985_v59, 0.0  ;;  %v995_v32 = vmax.f32 %v987_v28, 0.0 }
 0x3ba   : > { %997 = vst [vmem:[%s279_s16 + $0x8] sm:$0xff] %v989_v29  ;;  %999 = vst [vmem:[%s279_s16 + $0x18] sm:$0xff] %v991_v30 }
 0x3bb   : > { %1001 = vst [vmem:[%s279_s16 + $0x28] sm:$0xff] %v993_v31  ;;  %1003 = vst [vmem:[%s279_s16 + $0x38] sm:$0xff] %v995_v32 }
 0x3bc PF: > { %s18_s21 = sadd.s32 1, %s1246_s21  }
 0x3bd   : > { %p15_p3 = scmp.ge.s32.totalorder %s18_s21, 4  }
 0x3bf   :  { %17 = sbr.rel (!%p15_p3) target bundleno = 2 (0x2), region = 83 }
 0x3c4   :  { %1025 = vsyncpa [#allocation3], 1 }
 0x3c5   :  { %1027 = vsyncpa [#allocation3 + $0x1], 1 }
 0x3c6   :  { %1028 = vsyncpa [#allocation5], 1 }

</bundles_post_ra>
